<compile_context>
chip_gen: v5e
topology: v5e:2x2
jax: 0.10.0
libtpu: 0.0.40
codegen_flags: <defaults>
</compile_context>

<pallas_src>
import functools
import math

import jax
import jax.numpy as jnp
from jax.experimental import pallas as pl
from jax.experimental.pallas import tpu as pltpu

PRIOR_MEAN = 0.0
PRIOR_RHO = -3.0  # prior std = softplus(-3) ~ 0.0486

# bf16 operands for the mean-path matmuls (accumulation stays f32 via
# preferred_element_type).  Variance path stays f32 for numerical safety.
MATMUL_DTYPE = jnp.bfloat16


def _round_up(x, m):
    return (x + m - 1) // m * m


def _cdiv(a, b):
    return (a + b - 1) // b


def _largest_divisor(n, cap=8):
    best = 1
    for c in range(1, min(n, cap) + 1):
        if n % c == 0:
            best = c
    return best


def _stable_softplus(x):
    # softplus(x) = log(1 + exp(x)), stable for large |x|.
    return jnp.logaddexp(x, 0.0)


def _mm(a, b):
    # Cast the activation to the weight dtype (bf16 mean path / f32 var path);
    # accumulate in f32 on the MXU.
    return jnp.dot(a.astype(b.dtype), b, preferred_element_type=jnp.float32)


# ---------------------------------------------------------------------------
# Fused forward kernel: whole layer stack + one sample chunk per grid step.
# Ref layout: x, then per layer [wmu, wsig2, bmu, bsig2, eps] (sample mode)
# or [wmu, bmu] (MAP mode), then the output ref.
# ---------------------------------------------------------------------------
def bnn_fused_kernel(*refs, n_layers, s_chunk, sample):
    per = 5 if sample else 2
    x_ref = refs[0]
    lrefs = refs[1:1 + per * n_layers]
    out_ref = refs[1 + per * n_layers]

    x = x_ref[...]                                   # (tb, D0p), f32
    tb = x.shape[0]

    if not sample:
        h = x
        for l in range(n_layers):
            wmu = lrefs[per * l]
            bmu = lrefs[per * l + 1]
            z = _mm(h, wmu[...]) + bmu[...]
            if l < n_layers - 1:
                z = jnp.maximum(z, 0.0)
            h = z
        out_ref[...] = h[None].astype(out_ref.dtype)
        return

    # ---- sample mode ------------------------------------------------------
    # Layer 0: mean / std are sample-invariant -> compute ONCE per tile
    # (hoisted out of the per-sample work); only the eps draw differs.
    wmu0, wsig20, bmu0, bsig20, eps0_ref = lrefs[0:5]
    z0_mean = _mm(x, wmu0[...]) + bmu0[...]                       # (tb, D1p)
    z0_std = jnp.sqrt(_mm(x * x, wsig20[...]) + bsig20[...])      # (tb, D1p)
    eps0 = eps0_ref[...]                                          # (s_chunk, tb, D1p)
    z = z0_mean[None] + z0_std[None] * eps0                       # (s_chunk, tb, D1p)

    if n_layers == 1:
        out_ref[...] = z.astype(out_ref.dtype)
        return

    d1 = z.shape[-1]
    # Fold the sample chunk into the matmul M dimension: one big matmul pair
    # per layer instead of s_chunk small (tb, D) ones.
    h = jnp.maximum(z, 0.0).reshape(s_chunk * tb, d1)
    for l in range(1, n_layers):
        wmu, wsig2, bmu, bsig2, eps_ref = lrefs[per * l: per * l + 5]
        dout = wmu.shape[-1]
        eps = eps_ref[...].reshape(s_chunk * tb, dout)
        var = _mm(h * h, wsig2[...]) + bsig2[...]
        z = _mm(h, wmu[...]) + bmu[...] + jnp.sqrt(var) * eps
        if l < n_layers - 1:
            z = jnp.maximum(z, 0.0)
        h = z

    out_ref[...] = h.reshape(s_chunk, tb, h.shape[-1]).astype(out_ref.dtype)


def bnn_fused_forward(xp, layer_params, eps_list, *, sample, tb, s_chunk,
                      n_samples):
    Bp, D0p = xp.shape
    n_layers = len(layer_params)
    n_bt = Bp // tb
    n_sc = n_samples // s_chunk
    grid = (n_bt, n_sc)
    D_last = layer_params[-1][0].shape[-1]

    def const_spec(shape):
        # Weight / bias blocks: constant block index -> fetched once, stays
        # VMEM-resident across all grid steps.
        zeros = (0,) * len(shape)
        return pl.BlockSpec(shape, lambda bi, sc: zeros)

    in_specs = [pl.BlockSpec((tb, D0p), lambda bi, sc: (bi, 0))]
    args = [xp]
    needed = 2 * tb * D0p * 4 + 2 * s_chunk * tb * D_last * 4  # x + out blocks
    for l, (wmu, wsig2, bmu, bsig2) in enumerate(layer_params):
        din_p, dout_p = wmu.shape
        if sample:
            in_specs += [
                const_spec((din_p, dout_p)),
                const_spec((din_p, dout_p)),
                const_spec((1, dout_p)),
                const_spec((1, dout_p)),
                pl.BlockSpec((s_chunk, tb, dout_p), lambda bi, sc: (sc, bi, 0)),
            ]
            args += [wmu, wsig2, bmu, bsig2, eps_list[l]]
            needed += 2 * (wmu.size * wmu.dtype.itemsize + wsig2.size * 4
                           + bmu.size * 4 + bsig2.size * 4)
            needed += 2 * s_chunk * tb * dout_p * 4            # eps block
        else:
            in_specs += [const_spec((din_p, dout_p)), const_spec((1, dout_p))]
            args += [wmu, bmu]
            needed += 2 * (wmu.size * wmu.dtype.itemsize + bmu.size * 4)

    vmem_limit = int(min(max(2 * needed + (4 << 20), 32 << 20), 64 << 20))

    kernel = functools.partial(bnn_fused_kernel, n_layers=n_layers,
                               s_chunk=s_chunk, sample=sample)
    return pl.pallas_call(
        kernel,
        out_shape=jax.ShapeDtypeStruct((n_samples, Bp, D_last), jnp.float32),
        grid=grid,
        in_specs=in_specs,
        out_specs=pl.BlockSpec((s_chunk, tb, D_last),
                               lambda bi, sc: (sc, bi, 0)),
        compiler_params=pltpu.CompilerParams(
            dimension_semantics=("parallel", "parallel"),
            vmem_limit_bytes=vmem_limit),
    )(*args)


# ---------------------------------------------------------------------------
# KL kernel: parameter-only, one tiny launch per layer, run ONCE and cached.
# Padded entries carry the prior (mu = prior_mean, sig = prior_sig) so they
# contribute exactly 0 to the sum.
# ---------------------------------------------------------------------------
def kl_kernel(wmu_ref, wsig_ref, bmu_ref, bsig_ref, kl_ref, *,
              prior_mean, prior_var):
    inv_pv = 1.0 / prior_var
    log_pv = math.log(prior_var)

    def kl_sum(mu, sig):
        return jnp.sum(0.5 * (sig * sig * inv_pv
                              + (prior_mean - mu) ** 2 * inv_pv
                              - 1.0 + log_pv - 2.0 * jnp.log(sig)))

    kl_ref[0, 0] = (kl_sum(wmu_ref[...], wsig_ref[...])
                    + kl_sum(bmu_ref[...], bsig_ref[...]))


def compute_layer_kl(wmu, wsig, bmu, bsig, *, prior_mean, prior_var):
    out = pl.pallas_call(
        functools.partial(kl_kernel, prior_mean=prior_mean,
                          prior_var=prior_var),
        out_shape=jax.ShapeDtypeStruct((1, 1), jnp.float32),
        in_specs=[pl.BlockSpec(memory_space=pltpu.MemorySpace.VMEM)] * 4,
        out_specs=pl.BlockSpec(memory_space=pltpu.MemorySpace.SMEM),
    )(wmu, wsig, bmu, bsig)
    return out[0, 0]


# ---------------------------------------------------------------------------
# Model wrapper
# ---------------------------------------------------------------------------
class BNNPallas:
    """JAX/Pallas port of BNN: a stack of Bayesian linear layers."""

    def __init__(self, dims, key):
        self.dims = list(dims)
        self.layers = []
        for i in range(len(dims) - 1):
            key, sub = jax.random.split(key)
            din, dout = dims[i], dims[i + 1]
            wmu = 0.1 * jax.random.normal(sub, (din, dout), jnp.float32)
            wrho = jnp.full((din, dout), PRIOR_RHO, jnp.float32)
            bmu = jnp.zeros((1, dout), jnp.float32)
            brho = jnp.full((1, dout), PRIOR_RHO, jnp.float32)
            self.layers.append((wmu, wrho, bmu, brho))
        self._prep = None

    def _prepare(self):
        if self._prep is not None:
            return self._prep
        dims = self.dims
        prior_sig = math.log1p(math.exp(PRIOR_RHO))
        prior_var = prior_sig ** 2

        params = []
        kl_total = jnp.float32(0.0)
        for l, (wmu, wrho, bmu, brho) in enumerate(self.layers):
            din, dout = dims[l], dims[l + 1]
            din_p, dout_p = _round_up(din, 128), _round_up(dout, 128)
            wsig = _stable_softplus(wrho)
            bsig = _stable_softplus(brho)

            # Forward slabs (zero padding keeps padded lanes identically 0).
            wmu_p = (jnp.zeros((din_p, dout_p), jnp.float32)
                     .at[:din, :dout].set(wmu).astype(MATMUL_DTYPE))
            wsig2_p = (jnp.zeros((din_p, dout_p), jnp.float32)
                       .at[:din, :dout].set(wsig * wsig))
            bmu_p = jnp.zeros((1, dout_p), jnp.float32).at[:, :dout].set(bmu)
            bsig2_p = (jnp.zeros((1, dout_p), jnp.float32)
                       .at[:, :dout].set(bsig * bsig))
            params.append((wmu_p, wsig2_p, bmu_p, bsig2_p))

            # KL slabs (prior padding -> padded entries contribute 0 KL).
            kl_wmu = (jnp.full((din_p, dout_p), PRIOR_MEAN, jnp.float32)
                      .at[:din, :dout].set(wmu))
            kl_wsig = (jnp.full((din_p, dout_p), prior_sig, jnp.float32)
                       .at[:din, :dout].set(wsig))
            kl_bmu = (jnp.full((1, dout_p), PRIOR_MEAN, jnp.float32)
                      .at[:, :dout].set(bmu))
            kl_bsig = (jnp.full((1, dout_p), prior_sig, jnp.float32)
                       .at[:, :dout].set(bsig))
            kl_total = kl_total + compute_layer_kl(
                kl_wmu, kl_wsig, kl_bmu, kl_bsig,
                prior_mean=PRIOR_MEAN, prior_var=prior_var)

        self._prep = dict(params=params, kl=kl_total)
        return self._prep

    def _run(self, x, *, n_samples, sample, key=None):
        prep = self._prepare()
        params = prep["params"]
        B, din = x.shape
        assert din == self.dims[0]
        D0p = params[0][0].shape[0]

        # Batch tiling: cap tile at 256 rows, split into >=2 tiles when the
        # batch is big enough (v7x megacore), pad only to the tile multiple.
        Bp8 = _round_up(B, 8)
        n_bt = max(1, _cdiv(Bp8, 256))
        if Bp8 >= 256:
            n_bt = max(n_bt, 2)
        tb = _round_up(_cdiv(Bp8, n_bt), 8)
        Bp = tb * n_bt

        xp = jnp.zeros((Bp, D0p), jnp.float32).at[:B, :din].set(
            x.astype(jnp.float32))

        # Sample chunking: small output block, samples inside a chunk are
        # folded into the matmul M dimension by the kernel.
        s_chunk = _largest_divisor(n_samples, cap=8)

        eps_list = None
        if sample:
            if key is None:
                raise ValueError("sampling modes require a PRNG key")
            keys = jax.random.split(key, len(params))
            # TODO(synk): on real TPU this is better done in-kernel with
            # pltpu.prng_seed + pltpu.stateful_normal (no HBM eps traffic),
            # but those primitives have no CPU/interpret lowering.
            eps_list = [
                jax.random.normal(keys[l],
                                  (n_samples, Bp, params[l][0].shape[1]),
                                  jnp.float32)
                for l in range(len(params))]

        outp = bnn_fused_forward(xp, params, eps_list, sample=sample, tb=tb,
                                 s_chunk=s_chunk, n_samples=n_samples)
        return outp[:, :B, :self.dims[-1]]          # (n_samples, B, Dout)

    def forward(self, x, mode, key=None):
        prep = self._prepare()
        if mode == 'forward':
            out = self._run(x, n_samples=1, sample=True, key=key)[0]
            return out, prep["kl"]
        elif mode == 'MAP':
            return self._run(x, n_samples=1, sample=False)[0]
        elif mode == 'MC':
            return self._run(x, n_samples=1, sample=True, key=key)[0]
        else:
            raise ValueError(mode)

    def Forward(self, x, y, n_samples, type, key):
        assert type in {'Gaussian', 'Softmax'}, 'Likelihood type not found'
        prep = self._prepare()
        # All n_samples forward passes are fused into ONE kernel launch.
        outs = self._run(x, n_samples=n_samples, sample=True, key=key)
        if type == 'Gaussian':
            total_likelh = (-0.5 * (y[None, :, :] - outs) ** 2).sum()
        else:
            # TODO(synk): Softmax path mirrors the reference's
            # log(out.gather(1, y)) on raw (unnormalized) outputs; plain-JAX glue.
            yi = jnp.broadcast_to(y[None, :, :], (n_samples,) + y.shape)
            total_likelh = jnp.log(jnp.take_along_axis(outs, yi, axis=2)).sum()
        # KL depends only on the parameters: identical for every sample.
        total_kl = prep["kl"] * n_samples
        return total_kl / n_samples, total_likelh / n_samples

    @staticmethod
    def loss_fn(kl, lklh, n_batch):
        return (kl / n_batch - lklh).mean()


if __name__ == "__main__":
    key = jax.random.PRNGKey(0)
    kx, kp, kn, ky, kf = jax.random.split(key, 5)

    B, Din, H, Dout = 8, 16, 32, 8
    x = jax.random.normal(kx, (B, Din), jnp.float32)
    y = jax.random.normal(ky, (B, Dout), jnp.float32)

    model = BNNPallas([Din, H, H, Dout], key=kp)

    # mode='forward' : (output, KL)
    out, kl = model.forward(x, mode='forward', key=kn)
    out = jax.block_until_ready(out)
    kl = jax.block_until_ready(kl)
    assert out.shape == (B, Dout) and jnp.isfinite(out).all() and jnp.isfinite(kl)

    # mode='MAP' : deterministic output; cross-check against plain JAX (f32
    # reference vs bf16 mean-path matmuls in the kernel -> loose tolerance).
    out_map = jax.block_until_ready(model.forward(x, mode='MAP'))
    assert out_map.shape == (B, Dout) and jnp.isfinite(out_map).all()
    h = x
    for i, (wmu, wrho, bmu, brho) in enumerate(model.layers):
        h = h @ wmu + bmu
        if i < len(model.layers) - 1:
            h = jnp.maximum(h, 0.0)
    assert jnp.allclose(out_map, h, atol=5e-2, rtol=5e-2)

    # Cached KL matches a plain-JAX reference.
    prior_sig = math.log1p(math.exp(PRIOR_RHO))
    pv, log_pv = prior_sig ** 2, 2.0 * math.log(prior_sig)
    kl_ref = 0.0
    for (wmu, wrho, bmu, brho) in model.layers:
        for mu, rho in ((wmu, wrho), (bmu, brho)):
            sig = _stable_softplus(rho)
            kl_ref = kl_ref + jnp.sum(0.5 * (sig * sig / pv
                                             + (PRIOR_MEAN - mu) ** 2 / pv
                                             - 1.0 + log_pv
                                             - 2.0 * jnp.log(sig)))
    assert jnp.allclose(kl, kl_ref, rtol=1e-3, atol=1e-2)

    # mode='MC' : sampled output, no KL
    out_mc = jax.block_until_ready(model.forward(x, mode='MC', key=kn))
    assert out_mc.shape == (B, Dout) and jnp.isfinite(out_mc).all()

    # Forward(): MC estimate of KL and Gaussian log-likelihood, then loss_fn
    avg_kl, avg_lklh = model.Forward(x, y, n_samples=2, type='Gaussian', key=kf)
    loss = jax.block_until_ready(BNNPallas.loss_fn(avg_kl, avg_lklh, n_batch=B))
    assert jnp.isfinite(loss)

    print("KERNEL_OK")
</pallas_src>

<mosaic_0001>
module attributes {stable_mosaic.version = 11 : i64} {
  func.func @kl_kernel(%arg0: memref<128x128xf32, #tpu.memory_space<vmem>>, %arg1: memref<128x128xf32, #tpu.memory_space<vmem>>, %arg2: memref<1x128xf32, #tpu.memory_space<vmem>>, %arg3: memref<1x128xf32, #tpu.memory_space<vmem>>, %arg4: memref<1x1xf32, #tpu.memory_space<smem>>) attributes {dimension_semantics = [], scalar_prefetch = 0 : i64, scratch_operands = 0 : i64, tpu.core_type = #tpu.core_type<tc>} {
    %c0 = arith.constant 0 : index
    %c0_0 = arith.constant 0 : index
    %0 = vector.load %arg0[%c0, %c0_0] : memref<128x128xf32, #tpu.memory_space<vmem>>, vector<128x128xf32>
    %c0_1 = arith.constant 0 : index
    %c0_2 = arith.constant 0 : index
    %1 = vector.load %arg1[%c0_1, %c0_2] : memref<128x128xf32, #tpu.memory_space<vmem>>, vector<128x128xf32>
    %2 = arith.mulf %1, %1 : vector<128x128xf32>
    %cst = arith.constant 423.597656 : f32
    %3 = vector.broadcast %cst : f32 to vector<128x128xf32>
    %4 = arith.mulf %2, %3 : vector<128x128xf32>
    %cst_3 = arith.constant 0.000000e+00 : f32
    %5 = vector.broadcast %cst_3 : f32 to vector<128x128xf32>
    %6 = arith.subf %5, %0 : vector<128x128xf32>
    %7 = arith.mulf %6, %6 : vector<128x128xf32>
    %cst_4 = arith.constant 423.597656 : f32
    %8 = vector.broadcast %cst_4 : f32 to vector<128x128xf32>
    %9 = arith.mulf %7, %8 : vector<128x128xf32>
    %10 = arith.addf %4, %9 : vector<128x128xf32>
    %cst_5 = arith.constant 1.000000e+00 : f32
    %11 = vector.broadcast %cst_5 : f32 to vector<128x128xf32>
    %12 = arith.subf %10, %11 : vector<128x128xf32>
    %cst_6 = arith.constant -6.04878426 : f32
    %13 = vector.broadcast %cst_6 : f32 to vector<128x128xf32>
    %14 = arith.addf %12, %13 : vector<128x128xf32>
    %15 = math.log %1 : vector<128x128xf32>
    %cst_7 = arith.constant 2.000000e+00 : f32
    %16 = vector.broadcast %cst_7 : f32 to vector<128x128xf32>
    %17 = arith.mulf %16, %15 : vector<128x128xf32>
    %18 = arith.subf %14, %17 : vector<128x128xf32>
    %cst_8 = arith.constant 5.000000e-01 : f32
    %19 = vector.broadcast %cst_8 : f32 to vector<128x128xf32>
    %20 = arith.mulf %19, %18 : vector<128x128xf32>
    %21 = vector.shape_cast %20 : vector<128x128xf32> to vector<1x128x128xf32>
    %cst_9 = arith.constant dense<0.000000e+00> : vector<1xf32>
    %22 = vector.multi_reduction <add>, %21, %cst_9 [1, 2] : vector<1x128x128xf32> to vector<1xf32>
    %23 = vector.shape_cast %22 : vector<1xf32> to vector<1x1x1xf32>
    %24 = vector.extract %23[0, 0, 0] : f32 from vector<1x1x1xf32>
    %c0_10 = arith.constant 0 : index
    %c0_11 = arith.constant 0 : index
    %25 = vector.load %arg2[%c0_10, %c0_11] : memref<1x128xf32, #tpu.memory_space<vmem>>, vector<1x128xf32>
    %c0_12 = arith.constant 0 : index
    %c0_13 = arith.constant 0 : index
    %26 = vector.load %arg3[%c0_12, %c0_13] : memref<1x128xf32, #tpu.memory_space<vmem>>, vector<1x128xf32>
    %27 = arith.mulf %26, %26 : vector<1x128xf32>
    %cst_14 = arith.constant 423.597656 : f32
    %28 = vector.broadcast %cst_14 : f32 to vector<1x128xf32>
    %29 = arith.mulf %27, %28 : vector<1x128xf32>
    %cst_15 = arith.constant 0.000000e+00 : f32
    %30 = vector.broadcast %cst_15 : f32 to vector<1x128xf32>
    %31 = arith.subf %30, %25 : vector<1x128xf32>
    %32 = arith.mulf %31, %31 : vector<1x128xf32>
    %cst_16 = arith.constant 423.597656 : f32
    %33 = vector.broadcast %cst_16 : f32 to vector<1x128xf32>
    %34 = arith.mulf %32, %33 : vector<1x128xf32>
    %35 = arith.addf %29, %34 : vector<1x128xf32>
    %cst_17 = arith.constant 1.000000e+00 : f32
    %36 = vector.broadcast %cst_17 : f32 to vector<1x128xf32>
    %37 = arith.subf %35, %36 : vector<1x128xf32>
    %cst_18 = arith.constant -6.04878426 : f32
    %38 = vector.broadcast %cst_18 : f32 to vector<1x128xf32>
    %39 = arith.addf %37, %38 : vector<1x128xf32>
    %40 = math.log %26 : vector<1x128xf32>
    %cst_19 = arith.constant 2.000000e+00 : f32
    %41 = vector.broadcast %cst_19 : f32 to vector<1x128xf32>
    %42 = arith.mulf %41, %40 : vector<1x128xf32>
    %43 = arith.subf %39, %42 : vector<1x128xf32>
    %cst_20 = arith.constant 5.000000e-01 : f32
    %44 = vector.broadcast %cst_20 : f32 to vector<1x128xf32>
    %45 = arith.mulf %44, %43 : vector<1x128xf32>
    %46 = vector.shape_cast %45 : vector<1x128xf32> to vector<1x1x128xf32>
    %cst_21 = arith.constant dense<0.000000e+00> : vector<1xf32>
    %47 = vector.multi_reduction <add>, %46, %cst_21 [1, 2] : vector<1x1x128xf32> to vector<1xf32>
    %48 = vector.shape_cast %47 : vector<1xf32> to vector<1x1x1xf32>
    %49 = vector.extract %48[0, 0, 0] : f32 from vector<1x1x1xf32>
    %50 = arith.addf %24, %49 : f32
    %c0_22 = arith.constant 0 : index
    %c0_23 = arith.constant 0 : index
    %51 = memref.load %arg4[%c0_22, %c0_23] : memref<1x1xf32, #tpu.memory_space<smem>>
    memref.store %50, %arg4[%c0_22, %c0_23] : memref<1x1xf32, #tpu.memory_space<smem>>
    return
  }
}

</mosaic_0001>

<bundles_post_ra>
// kernel: tpu_custom_call.1
= control target key start
LH: loop header
LB: loop body
LE: loop exit
PB: predicated region body
PF: predicated region fallthrough
CT: control target
= control target key end

     0   :  { %9 = vsyncpa [#allocation3], 0  ;;  %s662_s0 = inlined_call_operand.hbm [shape: f32[128,128], index: 0, kind: input, shape index: {}]   ;;  %s663_s1 = inlined_call_operand.hbm [shape: f32[128,128], index: 1, kind: input, shape index: {}]   ;;  %s664_s2 = inlined_call_operand.vmem [shape: f32[1,128], index: 2, kind: input, shape index: {}]   ;;  %s665_s3 = inlined_call_operand.vmem [shape: f32[1,128], index: 3, kind: input, shape index: {}]   ;;  %s666_s4 = inlined_call_operand.hbm [shape: f32[1,1], index: 4, kind: output, shape index: {}]  }
   0x1   :  { %10 = vsyncpa [#allocation6], 0 }
   0x2   :  { %11 = vsyncpa [#allocation4], 0  ;;  %s16_s17 = sshll.u32 %s662_s0, 4  ;;  %s486_s18 = smov [#allocation2]   ;;  %s17_s17 = int_to_ptr.hbm [resolvable:$true] %s16_s17 }
   0x3   :  { %s18_s19 = sshll.u32 %s486_s18, 4  ;;  %s29_s22 = sshll.u32 %s663_s1, 4  ;;  %s19_s19 = int_to_ptr.vmem [resolvable:$true] %s18_s19  ;;  %s30_s22 = int_to_ptr.hbm [resolvable:$true] %s29_s22 }
   0x4   :  { %s487_s23 = smov 128   ;;  %s488_s24 = smov 8  }
   0x5   :  { %24 = dma.hbm_to_vmem [thread:$0]  %s17_s17, 2048, %s19_s19, [#allocation3], %s487_s23, %s487_s23, %s488_s24  }
   0x6   :  { %s489_s25 = smov [#allocation5]  }
   0x7   :  { %s31_s26 = sshll.u32 %s489_s25, 4  ;;  %s32_s26 = int_to_ptr.vmem [resolvable:$true] %s31_s26 }
   0x8   :  { %37 = dma.hbm_to_vmem [thread:$0]  %s30_s22, 2048, %s32_s26, [#allocation6], %s487_s23, %s487_s23, %s488_s24  }
   0x9   :  { %480 = dma.done.wait [#allocation3], 2048  }
   0xa   :  { %481 = vsyncadd [#allocation3], 4294965248 }
   0xb   :  { %482 = dma.done.wait [#allocation6], 2048  }
   0xc   :  { %483 = vsyncadd [#allocation6], 4294965248  ;;  %v50_v0 = vld [vmem:[#allocation2] sm:$0xff]  ;;  %v51_v1 = vld [vmem:[#allocation2 + $0x8] sm:$0xff]  ;;  %vm329_vm0 = vcmask 1040384   ;;  %s348_s29 = sshll.u32 %s666_s4, 4  ;;  %s349_s29 = int_to_ptr.hbm [resolvable:$true] %s348_s29 }
   0xd   :  { %v52_v2 = vld [vmem:[#allocation2 + $0x10] sm:$0xff]  ;;  %v53_v3 = vld [vmem:[#allocation2 + $0x18] sm:$0xff]  ;;  %v522_v4 = vld [vmem:[#allocation2 + $0x20] sm:$0xff]  ;;  %v114_v9 = vsub.f32 0.0, %v50_v0  ;;  %v115_v13 = vsub.f32 0.0, %v51_v1  ;;  %s490_s7 = smov [#allocation7]  }
   0xe   :  { %v524_v5 = vld [vmem:[#allocation2 + $0x28] sm:$0xff]  ;;  %v526_v6 = vld [vmem:[#allocation2 + $0x30] sm:$0xff]  ;;  %v528_v7 = vld [vmem:[#allocation2 + $0x38] sm:$0xff]  ;;  %v116_v17 = vsub.f32 0.0, %v52_v2  ;;  %v117_v18 = vsub.f32 0.0, %v53_v3  ;;  %v118_v19 = vsub.f32 0.0, %v522_v4 }
   0xf   :  { %v530_v8 = vld [vmem:[#allocation2 + $0x40] sm:$0xff]  ;;  %v532_v10 = vld [vmem:[#allocation2 + $0x48] sm:$0xff]  ;;  %v534_v11 = vld [vmem:[#allocation2 + $0x50] sm:$0xff]  ;;  %v119_v23 = vsub.f32 0.0, %v524_v5  ;;  %v120_v24 = vsub.f32 0.0, %v526_v6  ;;  %v121_v25 = vsub.f32 0.0, %v528_v7  ;;  %v130_v32 = vmul.f32 %v114_v9, %v114_v9 }
  0x10   :  { %v536_v12 = vld [vmem:[#allocation2 + $0x58] sm:$0xff]  ;;  %v538_v14 = vld [vmem:[#allocation2 + $0x60] sm:$0xff]  ;;  %v540_v15 = vld [vmem:[#allocation2 + $0x68] sm:$0xff]  ;;  %v122_v29 = vsub.f32 0.0, %v530_v8  ;;  %v123_v30 = vsub.f32 0.0, %v532_v10  ;;  %v124_v31 = vsub.f32 0.0, %v534_v11  ;;  %v131_v39 = vmul.f32 %v115_v13, %v115_v13 }
  0x11   :  { %v542_v16 = vld [vmem:[#allocation5] sm:$0xff]  ;;  %v545_v20 = vld [vmem:[#allocation2 + $0x70] sm:$0xff]  ;;  %v547_v21 = vld [vmem:[#allocation2 + $0x78] sm:$0xff]  ;;  %v125_v37 = vsub.f32 0.0, %v536_v12  ;;  %v126_v38 = vsub.f32 0.0, %v538_v14  ;;  %v127_v44 = vsub.f32 0.0, %v540_v15  ;;  %v132_v46 = vmul.f32 %v116_v17, %v116_v17 }
  0x12   :  { %v549_v22 = vld [vmem:[#allocation5 + $0x8] sm:$0xff]  ;;  %v554_v26 = vld [vmem:[#allocation5 + $0x10] sm:$0xff]  ;;  %v556_v27 = vld [vmem:[#allocation5 + $0x18] sm:$0xff]  ;;  %v82_v36 = vmul.f32 %v542_v16, %v542_v16  ;;  %v128_v45 = vsub.f32 0.0, %v545_v20  ;;  %v129_v52 = vsub.f32 0.0, %v547_v21  ;;  %v133_v53 = vmul.f32 %v117_v18, %v117_v18 }
  0x13   :  { %v558_v28 = vld [vmem:[#allocation5 + $0x20] sm:$0xff]  ;;  %v563_v33 = vld [vmem:[#allocation5 + $0x28] sm:$0xff]  ;;  %v565_v34 = vld [vmem:[#allocation5 + $0x30] sm:$0xff]  ;;  %v83_v43 = vmul.f32 %v549_v22, %v549_v22  ;;  %v84_v50 = vmul.f32 %v554_v26, %v554_v26  ;;  %v85_v51 = vmul.f32 %v556_v27, %v556_v27  ;;  %v134_v11 = vmul.f32 %v118_v19, %v118_v19 }
  0x14   :  { %v567_v35 = vld [vmem:[#allocation5 + $0x38] sm:$0xff]  ;;  %v573_v40 = vld [vmem:[#allocation5 + $0x40] sm:$0xff]  ;;  %v575_v41 = vld [vmem:[#allocation5 + $0x48] sm:$0xff]  ;;  %v86_v56 = vmul.f32 %v558_v28, %v558_v28  ;;  %v87_v57 = vmul.f32 %v563_v33, %v563_v33  ;;  %v88_v58 = vmul.f32 %v565_v34, %v565_v34  ;;  %v98_v63 = vmul.f32 423.59766, %v82_v36 }
  0x15   :  { %v577_v42 = vld [vmem:[#allocation5 + $0x50] sm:$0xff]  ;;  %v583_v47 = vld [vmem:[#allocation5 + $0x58] sm:$0xff]  ;;  %v585_v48 = vld [vmem:[#allocation5 + $0x60] sm:$0xff]  ;;  %v89_v59 = vmul.f32 %v567_v35, %v567_v35  ;;  %v90_v60 = vmul.f32 %v573_v40, %v573_v40  ;;  %v91_v61 = vmul.f32 %v575_v41, %v575_v41  ;;  %v99_v3 = vmul.f32 423.59766, %v83_v43 }
  0x16   :  { %v587_v49 = vld [vmem:[#allocation5 + $0x68] sm:$0xff]  ;;  %v594_v54 = vld [vmem:[#allocation5 + $0x70] sm:$0xff]  ;;  %v596_v55 = vld [vmem:[#allocation5 + $0x78] sm:$0xff]  ;;  %v92_v62 = vmul.f32 %v577_v42, %v577_v42  ;;  %v93_v0 = vmul.f32 %v583_v47, %v583_v47  ;;  %v94_v1 = vmul.f32 %v585_v48, %v585_v48  ;;  %v100_v6 = vmul.f32 423.59766, %v84_v50 }
  0x17   :  { %668 = vst [vmem:[#allocation11_spill] sm:$0xff] %v596_v55  ;;  %v95_v2 = vmul.f32 %v587_v49, %v587_v49  ;;  %v96_v4 = vmul.f32 %v594_v54, %v594_v54  ;;  %v97_v5 = vmul.f32 %v596_v55, %v596_v55  ;;  %v101_v7 = vmul.f32 423.59766, %v85_v51 }
  0x18   :  { %v102_v8 = vmul.f32 423.59766, %v86_v56  ;;  %v103_v9 = vmul.f32 423.59766, %v87_v57  ;;  %v104_v10 = vmul.f32 423.59766, %v88_v58  ;;  %v135_v15 = vmul.f32 %v119_v23, %v119_v23 }
  0x19   :  { %v105_v12 = vmul.f32 423.59766, %v89_v59  ;;  %v106_v13 = vmul.f32 423.59766, %v90_v60  ;;  %v107_v14 = vmul.f32 423.59766, %v91_v61  ;;  %v136_v21 = vmul.f32 %v120_v24, %v120_v24 }
  0x1a   :  { %v108_v17 = vmul.f32 423.59766, %v92_v62  ;;  %v109_v18 = vmul.f32 423.59766, %v93_v0  ;;  %v622_v20 = vmul.f32 423.59766, %v94_v1  ;;  %v137_v50 = vmul.f32 %v121_v25, %v121_v25 }
  0x1b   :  { %v624_v36 = vmul.f32 423.59766, %v95_v2  ;;  %v626_v43 = vmul.f32 423.59766, %v96_v4  ;;  %v628_v55 = vmul.f32 423.59766, %v97_v5  ;;  %v138_v51 = vmul.f32 %v122_v29, %v122_v29 }
  0x1c   :  { %v139_v56 = vmul.f32 %v123_v30, %v123_v30  ;;  %v146_v57 = vmul.f32 423.59766, %v130_v32  ;;  %386 = vlog2.f32 %v542_v16  ;;  %v140_v19 = vmul.f32 %v124_v31, %v124_v31 }
  0x1d   :  { %v141_v58 = vmul.f32 %v125_v37, %v125_v37  ;;  %v147_v23 = vmul.f32 423.59766, %v131_v39  ;;  %388 = vlog2.f32 %v549_v22  ;;  %v142_v59 = vmul.f32 %v126_v38, %v126_v38 }
  0x1e   :  { %v143_v60 = vmul.f32 %v127_v44, %v127_v44  ;;  %v144_v24 = vmul.f32 %v128_v45, %v128_v45  ;;  %390 = vlog2.f32 %v554_v26  ;;  %v145_v61 = vmul.f32 %v129_v52, %v129_v52 }
  0x1f   :  { %v148_v62 = vmul.f32 423.59766, %v132_v46  ;;  %v149_v0 = vmul.f32 423.59766, %v133_v53  ;;  %v150_v1 = vmul.f32 423.59766, %v134_v11  ;;  %v162_v30 = vadd.f32 %v146_v57, %v98_v63 }
  0x20   :  { %v151_v25 = vmul.f32 423.59766, %v135_v15  ;;  %v152_v29 = vmul.f32 423.59766, %v136_v21  ;;  %392 = vlog2.f32 %v556_v27  ;;  %v153_v16 = vmul.f32 423.59766, %v137_v50 }
  0x21   :  { %v154_v31 = vmul.f32 423.59766, %v138_v51  ;;  %v155_v32 = vmul.f32 423.59766, %v139_v56  ;;  %v163_v37 = vadd.f32 %v147_v23, %v99_v3  ;;  %v156_v22 = vmul.f32 423.59766, %v140_v19 }
  0x22   :  { %v387_v39 = vpop.eup %386  ;;  %v157_v38 = vmul.f32 423.59766, %v141_v58  ;;  %v158_v44 = vmul.f32 423.59766, %v142_v59  ;;  %394 = vlog2.f32 %v558_v28  ;;  %v159_v45 = vmul.f32 423.59766, %v143_v60 }
  0x23   :  { %v389_v26 = vpop.eup %388  ;;  %v160_v46 = vmul.f32 423.59766, %v144_v24  ;;  %v635_v52 = vmul.f32 423.59766, %v145_v61  ;;  %v164_v53 = vadd.f32 %v148_v62, %v100_v6  ;;  %v165_v63 = vadd.f32 %v149_v0, %v101_v7 }
  0x24   :  { %v391_v2 = vpop.eup %390  ;;  %v166_v4 = vadd.f32 %v150_v1, %v102_v8  ;;  %v360_v27 = vadd.f32 -1.0, %v162_v30  ;;  %396 = vlog2.f32 %v563_v33  ;;  %v167_v5 = vadd.f32 %v151_v25, %v103_v9 }
  0x25   :  { %v361_v3 = vadd.f32 -1.0, %v163_v37  ;;  %v211_v11 = vmul.f32 0.6931472, %v387_v39  ;;  %v213_v15 = vmul.f32 0.6931472, %v389_v26  ;;  %v168_v50 = vadd.f32 %v152_v29, %v104_v10 }
  0x26   :  { %v393_v21 = vpop.eup %392  ;;  %v169_v51 = vadd.f32 %v153_v16, %v105_v12  ;;  %v170_v28 = vadd.f32 %v154_v31, %v106_v13  ;;  %398 = vlog2.f32 %v565_v34  ;;  %v171_v56 = vadd.f32 %v155_v32, %v107_v14 }
  0x27   :  { %v362_v57 = vadd.f32 -1.0, %v164_v53  ;;  %v215_v19 = vmul.f32 0.6931472, %v391_v2  ;;  %400 = vlog2.f32 %v567_v35  ;;  %v172_v7 = vadd.f32 %v156_v22, %v108_v17 }
  0x28   :  { %v395_v6 = vpop.eup %394  ;;  %v173_v8 = vadd.f32 %v157_v38, %v109_v18  ;;  %v363_v58 = vadd.f32 -1.0, %v165_v63  ;;  %v194_v33 = vadd.f32 -6.0487843, %v360_v27  ;;  %v195_v9 = vadd.f32 -6.0487843, %v361_v3 }
  0x29   :  { %v217_v23 = vmul.f32 0.6931472, %v393_v21  ;;  %v242_v59 = vmul.f32 2.0, %v211_v11  ;;  %v243_v60 = vmul.f32 2.0, %v213_v15  ;;  %v174_v10 = vadd.f32 %v158_v44, %v622_v20 }
  0x2a   :  { %v397_v24 = vpop.eup %396  ;;  %v175_v12 = vadd.f32 %v159_v45, %v624_v36  ;;  %v364_v34 = vadd.f32 -1.0, %v166_v4  ;;  %402 = vlog2.f32 %v573_v40  ;;  %v196_v13 = vadd.f32 -6.0487843, %v362_v57 }
  0x2b   :  { %v219_v14 = vmul.f32 0.6931472, %v395_v6  ;;  %404 = vlog2.f32 %v575_v41  ;;  %v244_v35 = vmul.f32 2.0, %v215_v19  ;;  %v176_v18 = vadd.f32 %v160_v46, %v626_v43 }
  0x2c   :  { %v399_v17 = vpop.eup %398  ;;  %v365_v61 = vadd.f32 -1.0, %v167_v5  ;;  %v197_v62 = vadd.f32 -6.0487843, %v363_v58  ;;  %406 = vlog2.f32 %v577_v42  ;;  %v221_v1 = vmul.f32 0.6931472, %v397_v24 }
  0x2d   :  { %v401_v0 = vpop.eup %400  ;;  %v245_v20 = vmul.f32 2.0, %v217_v23  ;;  %v258_v25 = vsub.f32 %v194_v33, %v242_v59  ;;  %v259_v36 = vsub.f32 %v195_v9, %v243_v60  ;;  %v366_v29 = vadd.f32 -1.0, %v168_v50 }
  0x2e   :  { %v367_v30 = vadd.f32 -1.0, %v169_v51  ;;  %v368_v40 = vadd.f32 -1.0, %v170_v28  ;;  %v198_v16 = vadd.f32 -6.0487843, %v364_v34  ;;  %v223_v31 = vmul.f32 0.6931472, %v399_v17 }
  0x2f   :  { %408 = vlog2.f32 %v583_v47  ;;  %v246_v41 = vmul.f32 2.0, %v219_v14  ;;  %v260_v32 = vsub.f32 %v196_v13, %v244_v35  ;;  %v369_v43 = vadd.f32 -1.0, %v171_v56  ;;  %v314_v56 = vld [vmem:[%s664_s2] sm:$0x1] }
  0x30   :  { %v403_v37 = vpop.eup %402  ;;  %v199_v39 = vadd.f32 -6.0487843, %v365_v61  ;;  %v225_v22 = vmul.f32 0.6931472, %v401_v0  ;;  %410 = vlog2.f32 %v585_v48  ;;  %v247_v38 = vmul.f32 2.0, %v221_v1 }
  0x31   :  { %v405_v42 = vpop.eup %404  ;;  %v261_v44 = vsub.f32 %v197_v62, %v245_v20  ;;  %v274_v26 = vmul.f32 0.5, %v258_v25  ;;  %v275_v45 = vmul.f32 0.5, %v259_v36  ;;  %v370_v53 = vadd.f32 -1.0, %v172_v7  ;;  %v669_v7 = vld [vmem:[#allocation11_spill] sm:$0xff] }
  0x32   :  { %v407_v46 = vpop.eup %406  ;;  %v371_v2 = vadd.f32 -1.0, %v173_v8  ;;  %v200_v63 = vadd.f32 -6.0487843, %v366_v29  ;;  %412 = vlog2.f32 %v587_v49  ;;  %v227_v47 = vmul.f32 0.6931472, %v403_v37 }
  0x33   :  { %v248_v4 = vmul.f32 2.0, %v223_v31  ;;  %v262_v27 = vsub.f32 %v198_v16, %v246_v41  ;;  %v276_v5 = vmul.f32 0.5, %v260_v32  ;;  %v372_v3 = vadd.f32 -1.0, %v174_v10 }
  0x34   :  { %v201_v11 = vadd.f32 -6.0487843, %v367_v30  ;;  %v229_v15 = vmul.f32 0.6931472, %v405_v42  ;;  %414 = vlog2.f32 %v594_v54  ;;  %v249_v21 = vmul.f32 2.0, %v225_v22 }
  0x35   :  { %v409_v48 = vpop.eup %408  ;;  %v263_v50 = vsub.f32 %v199_v39, %v247_v38  ;;  %v277_v51 = vmul.f32 0.5, %v261_v44  ;;  %v290_v28 = vadd.f32 %v275_v45, %v274_v26  ;;  %v373_v49 = vadd.f32 -1.0, %v175_v12  ;;  %v315_v12 = vld [vmem:[%s665_s3] sm:$0x1] }
  0x36   :  { %v411_v57 = vpop.eup %410  ;;  %v202_v19 = vadd.f32 -6.0487843, %v368_v40  ;;  %v231_v6 = vmul.f32 0.6931472, %v407_v46  ;;  %416 = vlog2.f32 %v669_v7  ;;  %v250_v8 = vmul.f32 2.0, %v227_v47 }
  0x37   :  { %v264_v58 = vsub.f32 %v200_v63, %v248_v4  ;;  %v278_v33 = vmul.f32 0.5, %v262_v27  ;;  %v291_v9 = vadd.f32 %v290_v28, %v276_v5  ;;  %v374_v23 = vadd.f32 -1.0, %v176_v18 }
  0x38   :  { %v413_v54 = vpop.eup %412  ;;  %v203_v59 = vadd.f32 -6.0487843, %v369_v43  ;;  %v233_v60 = vmul.f32 0.6931472, %v409_v48  ;;  %v318_v24 = vsub.f32 0.0, %v314_v56  ;;  %v251_v10 = vmul.f32 2.0, %v229_v15 }
  0x39   :  { %v265_v34 = vsub.f32 %v201_v11, %v249_v21  ;;  %v279_v13 = vmul.f32 0.5, %v263_v50  ;;  %v292_v14 = vadd.f32 %v291_v9, %v277_v51  ;;  %v177_v17 = vadd.f32 %v635_v52, %v628_v55 }
  0x3a   :  { %v415_v35 = vpop.eup %414  ;;  %v204_v61 = vadd.f32 -6.0487843, %v370_v53  ;;  %v205_v62 = vadd.f32 -6.0487843, %v371_v2  ;;  %v235_v0 = vmul.f32 0.6931472, %v411_v57  ;;  %v266_v18 = vsub.f32 %v202_v19, %v250_v8 }
  0x3b   :  { %v252_v1 = vmul.f32 2.0, %v231_v6  ;;  %v280_v20 = vmul.f32 0.5, %v264_v58  ;;  %v293_v25 = vadd.f32 %v292_v14, %v278_v33  ;;  %v206_v29 = vadd.f32 -6.0487843, %v372_v3 }
  0x3c   :  { %v417_v36 = vpop.eup %416  ;;  %v237_v30 = vmul.f32 0.6931472, %v413_v54  ;;  %v316_v40 = vmul.f32 %v315_v12, %v315_v12  ;;  %v319_v16 = vmul.f32 %v318_v24, %v318_v24  ;;  %v253_v31 = vmul.f32 2.0, %v233_v60 }
  0x3d   :  { %v267_v41 = vsub.f32 %v203_v59, %v251_v10  ;;  %v281_v32 = vmul.f32 0.5, %v265_v34  ;;  %v294_v37 = vadd.f32 %v293_v25, %v279_v13  ;;  %v375_v43 = vadd.f32 -1.0, %v177_v17 }
  0x3e   :  { %v207_v39 = vadd.f32 -6.0487843, %v373_v49  ;;  %v239_v22 = vmul.f32 0.6931472, %v415_v35  ;;  %v254_v55 = vmul.f32 2.0, %v235_v0  ;;  %v268_v52 = vsub.f32 %v204_v61, %v252_v1 }
  0x3f   :  { %v282_v42 = vmul.f32 0.5, %v266_v18  ;;  %v295_v38 = vadd.f32 %v294_v37, %v280_v20  ;;  %418 = vlog2.f32 %v315_v12  ;;  %v241_v44 = vmul.f32 0.6931472, %v417_v36 }
  0x40   :  { %v317_v26 = vmul.f32 423.59766, %v316_v40  ;;  %v320_v45 = vmul.f32 423.59766, %v319_v16  ;;  %v255_v46 = vmul.f32 2.0, %v237_v30  ;;  %v269_v53 = vsub.f32 %v205_v62, %v253_v31 }
  0x41   :  { %v283_v2 = vmul.f32 0.5, %v267_v41  ;;  %v296_v63 = vadd.f32 %v295_v38, %v281_v32  ;;  %v208_v47 = vadd.f32 -6.0487843, %v374_v23  ;;  %v256_v4 = vmul.f32 2.0, %v239_v22 }
  0x42   :  { %v270_v27 = vsub.f32 %v206_v29, %v254_v55  ;;  %v284_v5 = vmul.f32 0.5, %v268_v52  ;;  %v209_v11 = vadd.f32 -6.0487843, %v375_v43  ;;  %v321_v15 = vadd.f32 %v320_v45, %v317_v26 }
  0x43   :  { %v297_v3 = vadd.f32 %v296_v63, %v282_v42  ;;  %v257_v21 = vmul.f32 2.0, %v241_v44  ;;  %v271_v50 = vsub.f32 %v207_v39, %v255_v46  ;;  %v285_v51 = vmul.f32 0.5, %v269_v53 }
  0x44   :  { %v272_v56 = vsub.f32 %v208_v47, %v256_v4  ;;  %v286_v57 = vmul.f32 0.5, %v270_v27  ;;  %v376_v19 = vadd.f32 -1.0, %v321_v15 }
  0x45   :  { %v419_v48 = vpop.eup %418  ;;  %v298_v28 = vadd.f32 %v297_v3, %v283_v2  ;;  %v273_v7 = vsub.f32 %v209_v11, %v257_v21  ;;  %v287_v8 = vmul.f32 0.5, %v271_v50 }
  0x46   :  { %v325_v6 = vmul.f32 0.6931472, %v419_v48  ;;  %v288_v33 = vmul.f32 0.5, %v272_v56  ;;  %v323_v54 = vadd.f32 -6.0487843, %v376_v19 }
  0x47   :  { %v299_v49 = vadd.f32 %v298_v28, %v284_v5  ;;  %v289_v59 = vmul.f32 0.5, %v273_v7 }
  0x48   :  { %v326_v23 = vmul.f32 2.0, %v325_v6 }
  0x49   :  { %v300_v58 = vadd.f32 %v299_v49, %v285_v51 }
  0x4a   :  { %v327_v10 = vsub.f32 %v323_v54, %v326_v23 }
  0x4b   :  { %v301_v9 = vadd.f32 %v300_v58, %v286_v57 }
  0x4c   :  { %v328_v13 = vmul.f32 0.5, %v327_v10 }
  0x4d   :  { %v302_v60 = vadd.f32 %v301_v9, %v287_v8 }
  0x4e   :  { %v330_v14 = vsel %vm329_vm0, %v328_v13, 0.0 }
  0x4f   :  { %v303_v24 = vadd.f32 %v302_v60, %v288_v33 }
  0x51   :  { %v304_v34 = vadd.f32 %v303_v24, %v289_v59 }
  0x53   :  { %305 = vadd.xlane.f32.xlu0 %v304_v34 }
  0x5b   :  { %331 = vadd.xlane.f32.xlu0 %v330_v14 }
  0xc6   :  { %v306_v12 = vpop.xlane.xlu0 %305 }
  0xc7   :  { %v307_v35 = vrot.slane %v306_v12, 4 }
  0xc9   :  { %v308_v17 = vadd.f32 %v307_v35, %v306_v12 }
  0xcb   :  { %v309_v61 = vrot.slane %v308_v17, 2 }
  0xcd   :  { %v310_v62 = vadd.f32 %v309_v61, %v308_v17 }
  0xce   :  { %v332_v0 = vpop.xlane.xlu0 %331 }
  0xcf   :  { %v333_v1 = vrot.slane %v332_v0, 4  ;;  %v311_v18 = vrot.slane %v310_v62, 1 }
  0xd1   :  { %v334_v20 = vadd.f32 %v333_v1, %v332_v0  ;;  %v312_v25 = vadd.f32 %v311_v18, %v310_v62 }
  0xd3   :  { %v335_v36 = vrot.slane %v334_v20, 2  ;;  %377 = vpush %v312_v25 }
  0xd5   :  { %v336_v29 = vadd.f32 %v335_v36, %v334_v20 }
  0xd7   :  { %v337_v30 = vrot.slane %v336_v29, 1 }
  0xd9   :  { %v338_v40 = vadd.f32 %v337_v30, %v336_v29 }
  0xdb   :  { %379 = vpush %v338_v40 }
 0x104   :  { %s378_s30 = spop %377 }
 0x10c   :  { %s380_s5 = spop %379 }
 0x10d   :  { %s340_s6 = sadd.f32 %s380_s5, %s378_s30 }
 0x10f   :  { %342 = sst [smem:[#allocation7]] %s340_s6 }
 0x110   :  { %351 = dma.smem_to_hbm %s490_s7, 16, %s349_s29, [#allocation4]  }
 0x111   :  { %484 = dma.done.wait [#allocation4], 16  }
 0x112   :  { %485 = vsyncadd [#allocation4], 4294967280 }
 0x113   :  { %356 = sfence }
 0x114   :  { %357 = vsyncpa [#allocation3], 1 }
 0x115   :  { %358 = vsyncpa [#allocation6], 1 }
 0x116   :  { %359 = vsyncpa [#allocation4], 1 }

</bundles_post_ra>
